<compile_context>
chip_gen: v6e
topology: v6e:2x2x1
jax: 0.10.0
libtpu: 0.0.40
codegen_flags: <defaults>
</compile_context>

<pallas_src>
import jax
import jax.numpy as jnp
from jax.experimental import pallas as pl
from jax.experimental.pallas import tpu as pltpu

_BN_EPS = 1e-5


def _vmem_limit(byte_estimate):
    """Deterministic scoped-VMEM request: computed from block sizes + headroom."""
    return int(min(max(int(byte_estimate), 16 << 20), 64 << 20))


def _stage1_blocks(B, F, N, L, itemsize, budget_bytes=2 << 20):
    """Pick (Bt, Nt) so the (double-buffered) x block stays well inside VMEM."""
    per_batch = F * N * L * itemsize
    if per_batch <= budget_bytes:
        # Whole (F, N, L) slab per batch; batch several slabs per grid step to
        # amortize the ~0.35 us per-step overhead.
        bt = max(1, min(B, budget_bytes // max(per_batch, 1)))
        while B % bt:
            bt -= 1
        return bt, N
    # Slab too large for one step: tile the node axis.  p1's output block puts
    # N on the lane axis, so node tiles must be multiples of 128 (or full N).
    nt = max(128, (budget_bytes // (F * L * itemsize)) // 128 * 128)
    nt = min(nt, N)
    while nt > 128 and N % nt:
        nt -= 128
    if N % nt:
        nt = N  # TODO(synk): pad N in the wrapper for huge non-128-multiple graphs.
    return 1, nt


# ---------------------------------------------------------------------------
# Stage 1: per-batch projections.  Reads the bulk tensor x exactly once, in
# its native dtype and layout; both contractions are VPU reduce work.
# ---------------------------------------------------------------------------
def _proj_kernel(x_ref, w1_ref, w3_ref, p1_ref, p2_ref):
    # x_ref : (Bt, F, Nt, L) native dtype
    # w1_ref: (1, L) f32                     (W1.weight)
    # w3_ref: (1, F, 1, L) f32               (W3.weight broadcast along L)
    # p1_ref: (Bt, F, Nt) f32  -- lane-dense: nodes on the lane axis
    # p2_ref: (Bt, Nt, L) f32
    xb = x_ref[...].astype(jnp.float32)
    # p1[b, f, n] = sum_l x[b, f, n, l] * w1[l]        (lane reduce)
    p1_ref[...] = jnp.sum(xb * w1_ref[...], axis=-1).astype(p1_ref.dtype)
    # p2[b, n, l] = sum_f x[b, f, n, l] * w3[f]        (fused broadcast-MAC reduce)
    p2_ref[...] = jnp.sum(xb * w3_ref[...], axis=1).astype(p2_ref.dtype)


# ---------------------------------------------------------------------------
# Stage 2: batch-coupled BatchNorm + W2 (tiny tensors, grid=(1,)).
# ---------------------------------------------------------------------------
def _bn_kernel(p1_ref, p2_ref, w2_ref, bnp_ref, part1_ref, part2_ref):
    # p1_ref : (B, F, N) f32   (N on lanes)       p2_ref: (B, N, L) f32
    # w2_ref : (F, L, N) f32   (w2_ref[f, l, :] = W2.weight[l, f], lane-broadcast)
    # bnp_ref: (8, N) f32 rows = [g1, b1, g2, b2, g3, b3, vb, 0]
    # part1_ref: (B, L, N) f32                     part2_ref: (B, N, L) f32
    p1 = p1_ref[...]
    p2 = p2_ref[...]
    w2 = w2_ref[...]
    bnp = bnp_ref[...]
    b_dim, f_dim, _ = p1.shape
    l_dim = p2.shape[2]

    def bn_lane(t, g, b):
        # BatchNorm1d(num_features=N), training stats over (batch, axis-1);
        # the node channel sits on the lane axis (no Python unrolls).
        cnt = t.shape[0] * t.shape[1]
        mu = jnp.sum(jnp.sum(t, axis=1, keepdims=True),
                     axis=0, keepdims=True) * (1.0 / cnt)
        d = t - mu
        var = jnp.sum(jnp.sum(d * d, axis=1, keepdims=True),
                      axis=0, keepdims=True) * (1.0 / cnt)
        return d * jax.lax.rsqrt(var + _BN_EPS) * g + b

    # part1 = bn_w2( W2( bn_w1(p1) ) ) with N kept on the lane axis throughout.
    p1n = bn_lane(p1, bnp[0:1, :], bnp[1:2, :])                    # (B, F, N)
    # W2 contraction over F (K = F is tiny): VPU broadcast-MACs; the MXU is
    # reserved for the two N x N matmuls in the attention stage.
    q1 = p1n[:, 0:1, :] * w2[0]
    for f in range(1, f_dim):
        q1 = q1 + p1n[:, f:f + 1, :] * w2[f]                       # (B, L, N)
    part1_ref[...] = bn_lane(q1, bnp[2:3, :], bnp[3:4, :]).astype(part1_ref.dtype)

    # part2: bn_w3 batch statistics (the per-node affine gamma/beta is applied
    # lane-aligned in stage 3, after the per-batch transpose, to avoid any
    # lane->sublane relayout of the parameter vectors here).
    cnt2 = b_dim * l_dim
    mu2 = jnp.sum(jnp.sum(p2, axis=2, keepdims=True),
                  axis=0, keepdims=True) * (1.0 / cnt2)
    d2 = p2 - mu2
    var2 = jnp.sum(jnp.sum(d2 * d2, axis=2, keepdims=True),
                   axis=0, keepdims=True) * (1.0 / cnt2)
    part2_ref[...] = (d2 * jax.lax.rsqrt(var2 + _BN_EPS)).astype(part2_ref.dtype)


# ---------------------------------------------------------------------------
# Stage 3: scores -> relu -> V -> softmax, gridded ("parallel") over batch.
# ---------------------------------------------------------------------------
def _attn_kernel(part1_ref, part2_ref, vwt_ref, bnp_ref, s_ref):
    # part1_ref: (1, L, N)    part2_ref: (1, N, L) (bn_w3 normalized, no affine)
    # vwt_ref  : (N, N) = V.weight.T              bnp_ref: (8, N) (rows 4,5,6 used)
    # s_ref    : (1, N, N)
    f32 = jnp.float32
    bnp = bnp_ref[...]
    a = part1_ref[0].T                                   # (N, L): part1[b, i, l]
    bT = part2_ref[0].T                                  # (L, N): normalized p2, node on lanes
    bT = bT * bnp[4:5, :] + bnp[5:6, :]                  # bn_w3 affine, lane-aligned

    # scores[i, j] = sum_l part1[b, i, l] * bn_w3(p2)[b, j, l]     (MXU)
    scores = jnp.dot(a, bT, preferred_element_type=f32)  # (N, N)
    scores = jnp.maximum(scores, 0.0)

    # V: z[i, k] = sum_j scores[i, j] * Vw[k, j] + Vb[k]           (MXU)
    z = jnp.dot(scores, vwt_ref[...], preferred_element_type=f32)
    z = z + bnp[6:7, :]

    # softmax over the last axis; reciprocal on the EUP slot (one Newton step
    # keeps full f32 accuracy while leaving the VALU free for the N x N tail).
    m = jnp.max(z, axis=-1, keepdims=True)
    e = jnp.exp(z - m)
    denom = jnp.sum(e, axis=-1, keepdims=True)
    r = pl.reciprocal(denom, approx=True)
    r = r * (2.0 - denom * r)
    s_ref[0] = (e * r).astype(s_ref.dtype)


# ---------------------------------------------------------------------------
# Wrapper
# ---------------------------------------------------------------------------
def spatial_attention_forward(x, params):
    """SpatialAttentionLayer forward.  x: (B, in_features, num_nodes, in_len)."""
    B, F, N, L = x.shape
    f32 = jnp.float32

    # Tiny parameter prep only (weights); the bulk activation x is not touched.
    w1 = params['w1'].astype(f32).reshape(1, L)
    w3 = jnp.broadcast_to(params['w3'].astype(f32).reshape(1, F, 1, 1), (1, F, 1, L))
    w2 = jnp.broadcast_to(params['w2'].astype(f32).T.reshape(F, L, 1), (F, L, N))
    vwt = params['vw'].astype(f32).T                                  # (N, N)
    bn_pack = jnp.stack([params['g1'], params['b1'],
                         params['g2'], params['b2'],
                         params['g3'], params['b3'],
                         params['vb'], jnp.zeros((N,), f32)], axis=0).astype(f32)

    # ------------------------- stage 1: projections -------------------------
    bt, nt = _stage1_blocks(B, F, N, L, x.dtype.itemsize)
    xe = bt * F * nt * L
    est1 = (2 * (xe * x.dtype.itemsize + 4 * (bt * F * nt + bt * nt * L))
            + 3 * 4 * xe + 4 * (L + F * L) + (2 << 20))
    p1a, p2a = pl.pallas_call(
        _proj_kernel,
        out_shape=(jax.ShapeDtypeStruct((B, F, N), f32),   # lane-dense: N on lanes
                   jax.ShapeDtypeStruct((B, N, L), f32)),
        grid_spec=pltpu.PrefetchScalarGridSpec(
            num_scalar_prefetch=0,
            grid=(B // bt, N // nt),
            in_specs=[
                pl.BlockSpec((bt, F, nt, L), lambda b, n: (b, 0, n, 0)),
                pl.BlockSpec((1, L), lambda b, n: (0, 0)),
                pl.BlockSpec((1, F, 1, L), lambda b, n: (0, 0, 0, 0)),
            ],
            out_specs=(
                pl.BlockSpec((bt, F, nt), lambda b, n: (b, 0, n)),
                pl.BlockSpec((bt, nt, L), lambda b, n: (b, n, 0)),
            ),
        ),
        compiler_params=pltpu.CompilerParams(
            dimension_semantics=("parallel", "parallel"),
            vmem_limit_bytes=_vmem_limit(est1)),
    )(x, w1, w3)

    # ---------------- stage 2: batch-coupled BatchNorm + W2 -----------------
    est2 = 4 * (2 * (B * F * N + 2 * B * N * L + B * L * N)
                + 3 * B * L * N + F * L * N + 8 * N) + (2 << 20)
    part1, part2 = pl.pallas_call(
        _bn_kernel,
        out_shape=(jax.ShapeDtypeStruct((B, L, N), f32),
                   jax.ShapeDtypeStruct((B, N, L), f32)),
        grid_spec=pltpu.PrefetchScalarGridSpec(
            num_scalar_prefetch=0,
            grid=(1,),
            in_specs=[
                pl.BlockSpec((B, F, N), lambda i: (0, 0, 0)),
                pl.BlockSpec((B, N, L), lambda i: (0, 0, 0)),
                pl.BlockSpec((F, L, N), lambda i: (0, 0, 0)),
                pl.BlockSpec((8, N), lambda i: (0, 0)),
            ],
            out_specs=(
                pl.BlockSpec((B, L, N), lambda i: (0, 0, 0)),
                pl.BlockSpec((B, N, L), lambda i: (0, 0, 0)),
            ),
        ),
        compiler_params=pltpu.CompilerParams(
            dimension_semantics=("arbitrary",),
            vmem_limit_bytes=_vmem_limit(est2)),
    )(p1a, p2a, w2, bn_pack)

    # --------------- stage 3: scores -> relu -> V -> softmax ----------------
    # Parallel over batch (megacore / 2-TC friendly); only ~3*N^2 f32 live per
    # grid step instead of ~4*B*N^2 in a single fused invocation.
    # TODO(synk): for very large N, additionally tile the query-row axis.
    est3 = 4 * (2 * (2 * N * L + N * N) + N * N + 8 * N + 3 * N * N) + (2 << 20)
    S = pl.pallas_call(
        _attn_kernel,
        out_shape=jax.ShapeDtypeStruct((B, N, N), f32),
        grid_spec=pltpu.PrefetchScalarGridSpec(
            num_scalar_prefetch=0,
            grid=(B,),
            in_specs=[
                pl.BlockSpec((1, L, N), lambda b: (b, 0, 0)),
                pl.BlockSpec((1, N, L), lambda b: (b, 0, 0)),
                pl.BlockSpec((N, N), lambda b: (0, 0)),
                pl.BlockSpec((8, N), lambda b: (0, 0)),
            ],
            out_specs=pl.BlockSpec((1, N, N), lambda b: (b, 0, 0)),
        ),
        compiler_params=pltpu.CompilerParams(
            dimension_semantics=("parallel",),
            vmem_limit_bytes=_vmem_limit(est3)),
    )(part1, part2, vwt, bn_pack)
    return S


# ---------------------------------------------------------------------------
# Pure-JAX reference (mirrors the PyTorch forward, training-mode BatchNorm)
# ---------------------------------------------------------------------------
def spatial_attention_reference(x, params, eps=_BN_EPS):
    part1 = jnp.transpose(x, (0, 2, 1, 3))           # (B, N, F, L)
    part2 = jnp.transpose(x, (0, 2, 3, 1))           # (B, N, L, F)

    def bn(t, g, b):
        mu = jnp.mean(t, axis=(0, 2), keepdims=True)
        var = jnp.mean((t - mu) ** 2, axis=(0, 2), keepdims=True)
        tn = (t - mu) * jax.lax.rsqrt(var + eps)
        return tn * g.reshape(1, -1, 1) + b.reshape(1, -1, 1)

    p1 = jnp.einsum('bnfl,l->bnf', part1, params['w1'][0])       # W1
    p1 = bn(p1, params['g1'], params['b1'])
    p1 = jnp.einsum('bnf,lf->bnl', p1, params['w2'])             # W2
    p1 = bn(p1, params['g2'], params['b2'])

    p2 = jnp.einsum('bnlf,f->bnl', part2, params['w3'][0])       # W3
    p2 = bn(p2, params['g3'], params['b3'])
    p2 = jnp.transpose(p2, (0, 2, 1))                            # (B, L, N)

    s = jnp.matmul(p1, p2)                                       # (B, N, N)
    s = jnp.maximum(s, 0.0)
    s = jnp.einsum('bnm,km->bnk', s, params['vw']) + params['vb'].reshape(1, 1, -1)
    return jax.nn.softmax(s, axis=-1)


def init_params(key, num_nodes, in_features, in_len, dtype=jnp.float32):
    """Deterministic init mirroring the nn.Module defaults."""
    ks = jax.random.split(key, 5)

    def linear_weight(k, out_f, in_f):
        bound = 1.0 / (in_f ** 0.5)
        return jax.random.uniform(k, (out_f, in_f), dtype, -bound, bound)

    w1 = linear_weight(ks[0], 1, in_len)              # Linear(in_len, 1, bias=False)
    w2 = linear_weight(ks[1], in_len, in_features)    # Linear(in_features, in_len, bias=False)
    w3 = linear_weight(ks[2], 1, in_features)         # Linear(in_features, 1, bias=False)
    vw = linear_weight(ks[3], num_nodes, num_nodes)   # Linear(num_nodes, num_nodes)
    vbound = 1.0 / (num_nodes ** 0.5)
    vb = jax.random.uniform(ks[4], (num_nodes,), dtype, -vbound, vbound)

    ones = jnp.ones((num_nodes,), dtype)
    zeros = jnp.zeros((num_nodes,), dtype)
    return dict(w1=w1, w2=w2, w3=w3, vw=vw, vb=vb,
                g1=ones, b1=zeros, g2=ones, b2=zeros, g3=ones, b3=zeros)


if __name__ == "__main__":
    key = jax.random.PRNGKey(0)
    kx, kp = jax.random.split(key)

    B, F, N, L = 2, 4, 16, 8          # batch, in_features, num_nodes, in_len
    x = jax.random.normal(kx, (B, F, N, L), jnp.float32)
    params = init_params(kp, num_nodes=N, in_features=F, in_len=L)

    out = jax.block_until_ready(spatial_attention_forward(x, params))
    ref = spatial_attention_reference(x, params)

    assert out.shape == (B, N, N)
    max_err = float(jnp.max(jnp.abs(out - ref)))
    assert jnp.allclose(out, ref, atol=1e-4, rtol=1e-4), f"max abs err {max_err}"
    row_sums = jnp.sum(out, axis=-1)
    assert jnp.allclose(row_sums, jnp.ones_like(row_sums), atol=1e-4)

    print("KERNEL_OK")
</pallas_src>

<mosaic_0001>
module attributes {stable_mosaic.version = 11 : i64} {
  func.func @_proj_kernel(%arg0: i32, %arg1: i32, %arg2: memref<2x4x16x8xf32, #tpu.memory_space<vmem>>, %arg3: memref<1x8xf32, #tpu.memory_space<vmem>>, %arg4: memref<1x4x1x8xf32, #tpu.memory_space<vmem>>, %arg5: memref<2x4x16xf32, #tpu.memory_space<vmem>>, %arg6: memref<2x16x8xf32, #tpu.memory_space<vmem>>) attributes {dimension_semantics = [#tpu.dimension_semantics<parallel>, #tpu.dimension_semantics<parallel>], iteration_bounds = array<i64: 1, 1>, scalar_prefetch = 0 : i64, scratch_operands = 0 : i64, tpu.core_type = #tpu.core_type<tc>, window_params = [{transform_indices = @transform_0, window_bounds = array<i64: 2, 4, 16, 8>}, {pipeline_mode = #tpu.pipeline_mode<synchronous>, transform_indices = @transform_1, window_bounds = array<i64: 1, 8>}, {pipeline_mode = #tpu.pipeline_mode<synchronous>, transform_indices = @transform_2, window_bounds = array<i64: 1, 4, 1, 8>}, {transform_indices = @transform_3, window_bounds = array<i64: 2, 4, 16>}, {transform_indices = @transform_4, window_bounds = array<i64: 2, 16, 8>}]} {
    %c0 = arith.constant 0 : index
    %c0_0 = arith.constant 0 : index
    %c0_1 = arith.constant 0 : index
    %c0_2 = arith.constant 0 : index
    %0 = vector.load %arg2[%c0, %c0_0, %c0_1, %c0_2] : memref<2x4x16x8xf32, #tpu.memory_space<vmem>>, vector<2x4x16x8xf32>
    %c0_3 = arith.constant 0 : index
    %c0_4 = arith.constant 0 : index
    %1 = vector.load %arg3[%c0_3, %c0_4] : memref<1x8xf32, #tpu.memory_space<vmem>>, vector<1x8xf32>
    %2 = vector.shape_cast %1 : vector<1x8xf32> to vector<1x1x1x8xf32>
    %3 = vector.broadcast %2 : vector<1x1x1x8xf32> to vector<2x4x16x8xf32>
    %4 = arith.mulf %0, %3 : vector<2x4x16x8xf32>
    %cst = arith.constant dense<0.000000e+00> : vector<2x4x16xf32>
    %5 = vector.multi_reduction <add>, %4, %cst [3] : vector<2x4x16x8xf32> to vector<2x4x16xf32>
    %c0_5 = arith.constant 0 : index
    %c0_6 = arith.constant 0 : index
    %c0_7 = arith.constant 0 : index
    %6 = vector.load %arg5[%c0_5, %c0_6, %c0_7] : memref<2x4x16xf32, #tpu.memory_space<vmem>>, vector<2x4x16xf32>
    tpu.vector_store %arg5[%c0_5, %c0_6, %c0_7], %5 {strides = array<i32>} : memref<2x4x16xf32, #tpu.memory_space<vmem>>, vector<2x4x16xf32>,
    %c0_8 = arith.constant 0 : index
    %c0_9 = arith.constant 0 : index
    %c0_10 = arith.constant 0 : index
    %c0_11 = arith.constant 0 : index
    %7 = vector.load %arg4[%c0_8, %c0_9, %c0_10, %c0_11] : memref<1x4x1x8xf32, #tpu.memory_space<vmem>>, vector<1x4x1x8xf32>
    %8 = vector.broadcast %7 : vector<1x4x1x8xf32> to vector<2x4x16x8xf32>
    %9 = arith.mulf %0, %8 : vector<2x4x16x8xf32>
    %cst_12 = arith.constant dense<0.000000e+00> : vector<2x16x8xf32>
    %10 = vector.multi_reduction <add>, %9, %cst_12 [1] : vector<2x4x16x8xf32> to vector<2x16x8xf32>
    %c0_13 = arith.constant 0 : index
    %c0_14 = arith.constant 0 : index
    %c0_15 = arith.constant 0 : index
    %11 = vector.load %arg6[%c0_13, %c0_14, %c0_15] : memref<2x16x8xf32, #tpu.memory_space<vmem>>, vector<2x16x8xf32>
    tpu.vector_store %arg6[%c0_13, %c0_14, %c0_15], %10 {strides = array<i32>} : memref<2x16x8xf32, #tpu.memory_space<vmem>>, vector<2x16x8xf32>,
    return
  }
  func.func @transform_0(%arg0: i32, %arg1: i32) -> (i32, i32, i32, i32) {
    %c0_i32 = arith.constant 0 : i32
    %c0_i32_0 = arith.constant 0 : i32
    %c0_i32_1 = arith.constant 0 : i32
    return %arg0, %c0_i32, %arg1, %c0_i32_0 : i32, i32, i32, i32
  }
  func.func @transform_1(%arg0: i32, %arg1: i32) -> (i32, i32) {
    %c0_i32 = arith.constant 0 : i32
    %c0_i32_0 = arith.constant 0 : i32
    %c0_i32_1 = arith.constant 0 : i32
    return %c0_i32, %c0_i32_0 : i32, i32
  }
  func.func @transform_2(%arg0: i32, %arg1: i32) -> (i32, i32, i32, i32) {
    %c0_i32 = arith.constant 0 : i32
    %c0_i32_0 = arith.constant 0 : i32
    %c0_i32_1 = arith.constant 0 : i32
    %c0_i32_2 = arith.constant 0 : i32
    %c0_i32_3 = arith.constant 0 : i32
    return %c0_i32, %c0_i32_0, %c0_i32_1, %c0_i32_2 : i32, i32, i32, i32
  }
  func.func @transform_3(%arg0: i32, %arg1: i32) -> (i32, i32, i32) {
    %c0_i32 = arith.constant 0 : i32
    %c0_i32_0 = arith.constant 0 : i32
    return %arg0, %c0_i32, %arg1 : i32, i32, i32
  }
  func.func @transform_4(%arg0: i32, %arg1: i32) -> (i32, i32, i32) {
    %c0_i32 = arith.constant 0 : i32
    %c0_i32_0 = arith.constant 0 : i32
    return %arg0, %arg1, %c0_i32 : i32, i32, i32
  }
}

</mosaic_0001>

<bundles_post_ra>
// kernel: tpu_custom_call.1
= control target key start
LH: loop header
LB: loop body
LE: loop exit
PB: predicated region body
PF: predicated region fallthrough
CT: control target
= control target key end

     0   :  { %vm56_vm0 = vcmask 64512   ;;  %s513_s0 = inlined_call_operand.vmem [shape: f32[2,4,16,8], index: 0, kind: input, shape index: {}]   ;;  %s514_s1 = inlined_call_operand.vmem [shape: f32[1,8], index: 1, kind: input, shape index: {}]   ;;  %s515_s2 = inlined_call_operand.vmem [shape: f32[1,4,1,8], index: 2, kind: input, shape index: {}]   ;;  %s516_s3 = inlined_call_operand.hbm [shape: f32[2,4,16], index: 3, kind: output, shape index: {0}]   ;;  %s517_s4 = inlined_call_operand.vmem [shape: f32[2,16,8], index: 4, kind: output, shape index: {1}]  }
   0x1   :  { %v19_v0 = vld [vmem:[%s513_s0 + $0x10] sm:$0xff]  ;;  %v371_v1 = vld [vmem:[%s514_s1] ss:$0 sm:$0xff]  ;;  %v309_v2 = vld [vmem:[%s515_s2 + $0x1] ss:$0 sm:$0xff] }
   0x2   :  { %v42_v3 = vmul.f32 %v371_v1, %v19_v0  ;;  %v17_v4 = vld [vmem:[%s513_s0] sm:$0xff]  ;;  %v20_v6 = vld [vmem:[%s513_s0 + $0x18] sm:$0xff]  ;;  %v18_v10 = vld [vmem:[%s513_s0 + $0x8] sm:$0xff]  ;;  %v241_v16 = vmul.f32 %v309_v2, %v19_v0 }
   0x3   :  { %v308_v5 = vld [vmem:[%s515_s2] ss:$0 sm:$0xff]  ;;  %v40_v7 = vmul.f32 %v371_v1, %v17_v4  ;;  %v43_v8 = vmul.f32 %v371_v1, %v20_v6  ;;  %v242_v9 = vmul.f32 %v309_v2, %v20_v6  ;;  %v26_v11 = vld [vmem:[%s513_s0 + $0x48] sm:$0xff]  ;;  %v41_v13 = vmul.f32 %v371_v1, %v18_v10  ;;  %v28_v19 = vld [vmem:[%s513_s0 + $0x58] sm:$0xff] }
   0x4   :  { %v63_v12 = vsel %vm56_vm0, %v42_v3, 0.0  ;;  %v240_v14 = vmul.f32 %v308_v5, %v18_v10  ;;  %v25_v15 = vld [vmem:[%s513_s0 + $0x40] sm:$0xff]  ;;  %v239_v18 = vmul.f32 %v308_v5, %v17_v4  ;;  %v49_v23 = vmul.f32 %v371_v1, %v26_v11  ;;  %v27_v28 = vld [vmem:[%s513_s0 + $0x50] sm:$0xff] }
   0x5   :  { %64 = vadd.xlane.f32.xlu1 %v63_v12  ;;  %v57_v17 = vsel %vm56_vm0, %v40_v7, 0.0  ;;  %v66_v20 = vsel %vm56_vm0, %v43_v8, 0.0  ;;  %v263_v21 = vsel %vm56_vm0, %v242_v9, 0.0  ;;  %v60_v24 = vsel %vm56_vm0, %v41_v13, 0.0  ;;  %v310_v31 = vld [vmem:[%s515_s2 + $0x2] ss:$0 sm:$0xff] }
   0x6   :  { %58 = vadd.xlane.f32.xlu0 %v57_v17  ;;  %v262_v22 = vsel %vm56_vm0, %v240_v14, 0.0  ;;  %v248_v25 = vmul.f32 %v308_v5, %v26_v11  ;;  %v48_v26 = vmul.f32 %v371_v1, %v25_v15  ;;  %v247_v27 = vmul.f32 %v308_v5, %v25_v15 }
   0x7   :  { %v51_v29 = vmul.f32 %v371_v1, %v28_v19  ;;  %v250_v30 = vmul.f32 %v309_v2, %v28_v19 }
   0x8   :  { %10 = vsyncpa [#allocation3], 0  ;;  %v256_v32 = vsel %vm56_vm0, %v241_v16, 0.0  ;;  %v255_v33 = vsel %vm56_vm0, %v239_v18, 0.0  ;;  %v264_v34 = vadd.f32 %v263_v21, %v262_v22  ;;  %v249_v35 = vmul.f32 %v309_v2, %v27_v28  ;;  %v22_v40 = vld [vmem:[%s513_s0 + $0x28] sm:$0xff]  ;;  %v21_v45 = vld [vmem:[%s513_s0 + $0x20] sm:$0xff] }
   0x9   :  { %67 = vadd.xlane.f32.xlu1 %v66_v20  ;;  %v84_v36 = vsel %vm56_vm0, %v49_v23, 0.0  ;;  %v276_v37 = vsel %vm56_vm0, %v248_v25, 0.0  ;;  %v277_v38 = vsel %vm56_vm0, %v250_v30, 0.0  ;;  %v50_v39 = vmul.f32 %v371_v1, %v27_v28  ;;  %v30_v49 = vld [vmem:[%s513_s0 + $0x68] sm:$0xff]  ;;  %v29_v54 = vld [vmem:[%s513_s0 + $0x60] sm:$0xff]  ;;  %v24_v63 = vld [vmem:[%s513_s0 + $0x38] sm:$0xff] }
   0xa   :  { %61 = vadd.xlane.f32.xlu0 %v60_v24  ;;  %v81_v41 = vsel %vm56_vm0, %v48_v26, 0.0  ;;  %v269_v42 = vsel %vm56_vm0, %v247_v27, 0.0  ;;  %v270_v43 = vsel %vm56_vm0, %v249_v35, 0.0  ;;  %v244_v44 = vmul.f32 %v310_v31, %v22_v40  ;;  %v311_v55 = vld [vmem:[%s515_s2 + $0x3] ss:$0 sm:$0xff]  ;;  %v23_v4 = vld [vmem:[%s513_s0 + $0x30] sm:$0xff] }
   0xb   :  { %v257_v46 = vadd.f32 %v256_v32, %v255_v33  ;;  %v90_v47 = vsel %vm56_vm0, %v51_v29, 0.0  ;;  %v243_v48 = vmul.f32 %v310_v31, %v21_v45  ;;  %v278_v50 = vadd.f32 %v277_v38, %v276_v37  ;;  %v32_v9 = vld [vmem:[%s513_s0 + $0x78] sm:$0xff]  ;;  %v31_v14 = vld [vmem:[%s513_s0 + $0x70] sm:$0xff] }
   0xc   :  { %v45_v51 = vmul.f32 %v371_v1, %v22_v40  ;;  %v265_v52 = vsel %vm56_vm0, %v244_v44, 0.0  ;;  %v252_v53 = vmul.f32 %v310_v31, %v30_v49  ;;  %v271_v56 = vadd.f32 %v270_v43, %v269_v42 }
   0xd   :  { %85 = vadd.xlane.f32.xlu1 %v84_v36  ;;  %v44_v57 = vmul.f32 %v371_v1, %v21_v45  ;;  %v258_v58 = vsel %vm56_vm0, %v243_v48, 0.0  ;;  %v251_v59 = vmul.f32 %v310_v31, %v29_v54  ;;  %v87_v60 = vsel %vm56_vm0, %v50_v39, 0.0 }
   0xe   :  { %82 = vadd.xlane.f32.xlu0 %v81_v41  ;;  %v266_v61 = vadd.f32 %v265_v52, %v264_v34  ;;  %v279_v62 = vsel %vm56_vm0, %v252_v53, 0.0  ;;  %v259_v0 = vadd.f32 %v258_v58, %v257_v46  ;;  %v246_v3 = vmul.f32 %v311_v55, %v24_v63 }
   0xf   :  { %v272_v2 = vsel %vm56_vm0, %v251_v59, 0.0  ;;  %v72_v5 = vsel %vm56_vm0, %v45_v51, 0.0  ;;  %v53_v6 = vmul.f32 %v371_v1, %v30_v49  ;;  %v280_v7 = vadd.f32 %v279_v62, %v278_v50 }
  0x10   :  { %v245_v8 = vmul.f32 %v311_v55, %v23_v4  ;;  %v69_v10 = vsel %vm56_vm0, %v44_v57, 0.0  ;;  %v273_v11 = vadd.f32 %v272_v2, %v271_v56  ;;  %v267_v12 = vsel %vm56_vm0, %v246_v3, 0.0 }
  0x11   :  { %91 = vadd.xlane.f32.xlu1 %v90_v47  ;;  %v254_v13 = vmul.f32 %v311_v55, %v32_v9  ;;  %v52_v15 = vmul.f32 %v371_v1, %v29_v54  ;;  %v268_v16 = vadd.f32 %v267_v12, %v266_v61  ;;  %v253_v18 = vmul.f32 %v311_v55, %v31_v14 }
  0x12   :  { %88 = vadd.xlane.f32.xlu0 %v87_v60  ;;  %v260_v17 = vsel %vm56_vm0, %v245_v8, 0.0  ;;  %v96_v23 = vsel %vm56_vm0, %v53_v6, 0.0  ;;  %v47_v24 = vmul.f32 %v371_v1, %v24_v63  ;;  %v46_v27 = vmul.f32 %v371_v1, %v23_v4 }
  0x13   :  { %v261_v19 = vadd.f32 %v260_v17, %v259_v0  ;;  %v281_v20 = vsel %vm56_vm0, %v254_v13, 0.0  ;;  %284 = vst.msk [vmem:[%s517_s4 + $0x8] sm:$0xff] %vm56_vm0, %v268_v16  ;;  %v274_v22 = vsel %vm56_vm0, %v253_v18, 0.0  ;;  %v93_v26 = vsel %vm56_vm0, %v52_v15, 0.0 }
  0x14   :  { %v282_v21 = vadd.f32 %v281_v20, %v280_v7  ;;  %v275_v25 = vadd.f32 %v274_v22, %v273_v11  ;;  %v78_v28 = vsel %vm56_vm0, %v47_v24, 0.0  ;;  %v55_v29 = vmul.f32 %v371_v1, %v32_v9 }
  0x15   :  { %73 = vadd.xlane.f32.xlu1 %v72_v5  ;;  %283 = vst.msk [vmem:[%s517_s4] sm:$0xff] %vm56_vm0, %v261_v19  ;;  %v75_v30 = vsel %vm56_vm0, %v46_v27, 0.0  ;;  %v54_v31 = vmul.f32 %v371_v1, %v31_v14  ;;  %v121_v38 = vlaneseq  ;;  %vm132_vm1 = vcmask 130112  }
  0x16   :  { %70 = vadd.xlane.f32.xlu0 %v69_v10  ;;  %286 = vst.msk [vmem:[%s517_s4 + $0x18] sm:$0xff] %vm56_vm0, %v282_v21  ;;  %285 = vst.msk [vmem:[%s517_s4 + $0x10] sm:$0xff] %vm56_vm0, %v275_v25  ;;  %v102_v32 = vsel %vm56_vm0, %v55_v29, 0.0  ;;  %vm197_vm2 = vcmask 1041409   ;;  %vm199_vm3 = vcmask 1042434   ;;  %vm201_vm4 = vcmask 1043459  }
  0x17   :  { %v99_v33 = vsel %vm56_vm0, %v54_v31, 0.0  ;;  %v122_v41 = vand.u32 127, %v121_v38  ;;  %v124_v1 = vshrl.u32 %v121_v38, 7  ;;  %vm208_vm5 = vcmask 125952   ;;  %s337_s4 = smov [#allocation2]  }
  0x18   :  { %s292_s9 = sshll.u32 %s337_s4, 4  ;;  %s293_s9 = int_to_ptr.vmem [resolvable:$true] %s292_s9 }
  0x19   :  { %97 = vadd.xlane.f32.xlu1 %v96_v23  ;;  %v127_v42 = vadd.s32 4294967288, %v122_v41  ;;  %v125_v48 = vsub.s32 %v122_v41, %v124_v1  ;;  %s315_s10 = scalar_lea.vmem %s293_s9, 128  ;;  %p320_p1 = scmp.lt.s32.totalorder %s293_s9, %s293_s9 }
  0x1a   :  { %94 = vadd.xlane.f32.xlu0 %v93_v26  ;;  %p316_p0 = scmp.ne.s32.totalorder %s293_s9, %s315_s10  ;;  %p321_p2 = scmp.lt.s32.totalorder %s315_s10, %s315_s10 }
  0x1b   :  { %v130_v45 = vsub.s32 %v127_v42, %v124_v1 }
  0x1c   :  { %p322_p3 = por %p321_p2, %p320_p1 }
  0x1d   :  { %79 = vadd.xlane.f32.xlu1 %v78_v28 }
  0x1e   :  { %76 = vadd.xlane.f32.xlu0 %v75_v30  ;;  %p323_p4 = pnand %p322_p3, %p316_p0 }
  0x21   :  { %103 = vadd.xlane.f32.xlu1 %v102_v32 }
  0x22   :  { %100 = vadd.xlane.f32.xlu0 %v99_v33 }
  0x8e   :  { %v65_v34 = vpop.xlane.xlu1 %64 }
  0x8f   :  { %v59_v35 = vpop.xlane.xlu0 %58  ;;  %v137_v55 = vrot.slane %v65_v34, %v125_v48 }
  0x90   :  { %v126_v56 = vrot.slane %v59_v35, %v125_v48 }
  0x92   :  { %v68_v36 = vpop.xlane.xlu1 %67 }
  0x93   :  { %v62_v37 = vpop.xlane.xlu0 %61  ;;  %v141_v49 = vrot.slane %v68_v36, %v130_v45 }
  0x94   :  { %v131_v50 = vrot.slane %v62_v37, %v130_v45 }
  0x95   :  { %v142_v57 = vsel %vm132_vm1, %v141_v49, %v137_v55 }
  0x96   :  { %v86_v39 = vpop.xlane.xlu1 %85  ;;  %v133_v58 = vsel %vm132_vm1, %v131_v50, %v126_v56 }
  0x97   :  { %v83_v40 = vpop.xlane.xlu0 %82  ;;  %v168_v4 = vrot.slane %v86_v39, %v130_v45  ;;  %v198_v7 = vsel %vm197_vm2, %v142_v57, %v133_v58 }
  0x98   :  { %v164_v5 = vrot.slane %v83_v40, %v125_v48 }
  0x9a   :  { %v92_v43 = vpop.xlane.xlu1 %91  ;;  %v169_v16 = vsel %vm132_vm1, %v168_v4, %v164_v5 }
  0x9b   :  { %v89_v44 = vpop.xlane.xlu0 %88  ;;  %v177_v59 = vrot.slane %v92_v43, %v130_v45 }
  0x9c   :  { %v173_v60 = vrot.slane %v89_v44, %v125_v48 }
  0x9e   :  { %v74_v46 = vpop.xlane.xlu1 %73  ;;  %v178_v8 = vsel %vm132_vm1, %v177_v59, %v173_v60 }
  0x9f   :  { %v71_v47 = vpop.xlane.xlu0 %70  ;;  %v150_v52 = vrot.slane %v74_v46, %v130_v45  ;;  %v203_v18 = vsel %vm197_vm2, %v178_v8, %v169_v16 }
  0xa0   :  { %v146_v53 = vrot.slane %v71_v47, %v125_v48 }
  0xa2   :  { %v98_v51 = vpop.xlane.xlu1 %97  ;;  %v151_v62 = vsel %vm132_vm1, %v150_v52, %v146_v53 }
  0xa3   :  { %v95_v54 = vpop.xlane.xlu0 %94  ;;  %v186_v63 = vrot.slane %v98_v51, %v130_v45  ;;  %v200_v9 = vsel %vm199_vm3, %v151_v62, %v198_v7 }
  0xa4   :  { %v182_v0 = vrot.slane %v95_v54, %v125_v48 }
  0xa6   :  { %v80_v61 = vpop.xlane.xlu1 %79  ;;  %v187_v12 = vsel %vm132_vm1, %v186_v63, %v182_v0 }
  0xa7   :  { %v159_v2 = vrot.slane %v80_v61, %v130_v45  ;;  %v77_v3 = vpop.xlane.xlu0 %76  ;;  %v204_v19 = vsel %vm199_vm3, %v187_v12, %v203_v18 }
  0xa8   :  { %v155_v6 = vrot.slane %v77_v3, %v125_v48 }
  0xaa   :  { %v160_v10 = vsel %vm132_vm1, %v159_v2, %v155_v6  ;;  %v104_v11 = vpop.xlane.xlu1 %103 }
  0xab   :  { %v202_v13 = vsel %vm201_vm4, %v160_v10, %v200_v9  ;;  %v195_v14 = vrot.slane %v104_v11, %v130_v45  ;;  %v101_v15 = vpop.xlane.xlu0 %100 }
  0xac   :  { %209 = vst.msk [vmem:[#allocation2] sm:$0xf] %vm208_vm5, %v202_v13  ;;  %v191_v17 = vrot.slane %v101_v15, %v125_v48 }
  0xae   :  { %v196_v20 = vsel %vm132_vm1, %v195_v14, %v191_v17 }
  0xaf   :  { %v205_v21 = vsel %vm201_vm4, %v196_v20, %v204_v19 }
  0xb0   :  { %210 = vst.msk [vmem:[#allocation2 + $0x4] sm:$0xf] %vm208_vm5, %v205_v21 }
  0xb1   :  { %326 = shalt.err (!%p323_p4)
}
  0xb2   :  { %s338_s11 = smov 64   ;;  %s339_s12 = smov 4  }
  0xb3   :  { %298 = dma.vmem_to_hbm [thread:$0]  %s293_s9, 128, %s516_s3, [#allocation3], %s338_s11, %s338_s11, %s339_s12  }
  0xb4   :  { %335 = dma.done.wait [#allocation3], 128  }
  0xb5   :  { %336 = vsyncadd [#allocation3], 4294967168 }
  0xb6   :  { %306 = vsyncpa [#allocation3], 1 }

</bundles_post_ra>
